<compile_context>
chip_gen: v7x
topology: tpu7x:2x2x1
jax: 0.10.0
libtpu: 0.0.40
codegen_flags: <defaults>
</compile_context>

<pallas_src>
import math

import jax
import jax.numpy as jnp
from jax.experimental import pallas as pl
from jax.experimental.pallas import tpu as pltpu


# ------------------------------- kernel body ---------------------------------

def _ln_silu(h, gamma, beta, eps=1e-5):
    """LayerNorm (biased var, eps=1e-5, affine) + SiLU, all in f32.

    SiLU's sigmoid is computed as 0.5*(1 + tanh(x/2)) so the transcendental
    runs on the EUP and no VALU reciprocal/divide is needed.
    """
    mu = jnp.mean(h, axis=-1, keepdims=True)
    xc = h - mu
    var = jnp.mean(xc * xc, axis=-1, keepdims=True)
    hn = xc * jax.lax.rsqrt(var + eps) * gamma + beta
    return hn * (0.5 * jnp.tanh(0.5 * hn) + 0.5)


def _make_fused_kernel(depth, D, inv_sqrt_d):
    """Fused MLP + block-masked chain contraction.

    Ref order: x, [W, b, gamma, beta] * depth, wf, bf, grad_H, out.
    """
    n_w = 4 * depth + 2

    def kernel(*refs):
        x_ref = refs[0]
        w_refs = refs[1:1 + n_w]
        g_ref = refs[1 + n_w]
        o_ref = refs[2 + n_w]

        # ---- MLP (all layers fused; weights VMEM-resident) ----
        h = x_ref[...].astype(jnp.float32)
        for l in range(depth):                       # static unroll; depth is tiny
            W = w_refs[4 * l][...]
            b = w_refs[4 * l + 1][...].astype(jnp.float32)
            gamma_l = w_refs[4 * l + 2][...].astype(jnp.float32)
            beta_l = w_refs[4 * l + 3][...].astype(jnp.float32)
            h = jnp.dot(h.astype(W.dtype), W,
                        preferred_element_type=jnp.float32) + b
            h = _ln_silu(h, gamma_l, beta_l)
        wf = w_refs[4 * depth][...]
        bf = w_refs[4 * depth + 1][...].astype(jnp.float32)
        r = jnp.dot(h.astype(wf.dtype), wf,
                    preferred_element_type=jnp.float32) + bf        # (tb, D*D)

        # ---- block-diagonal masked chain: out[:, j] = g_j*<R_j,R_j> + g_{j^1}*<R_j,R_{j^1}>
        # R_j is r[:, j*D:(j+1)*D]; no dense mask, no batched DxD matmul, no reshape.
        g = g_ref[...].astype(jnp.float32)                           # (tb, D)
        cols = []
        for p in range(D // 2):                      # static unroll over 2x2 blocks
            ja, jb = 2 * p, 2 * p + 1
            ra = r[:, ja * D:(ja + 1) * D]                           # (tb, D)
            rb = r[:, jb * D:(jb + 1) * D]                           # (tb, D)
            naa = jnp.sum(ra * ra, axis=-1, keepdims=True)           # (tb, 1)
            nbb = jnp.sum(rb * rb, axis=-1, keepdims=True)
            nab = jnp.sum(ra * rb, axis=-1, keepdims=True)
            ga = g[:, ja:ja + 1]
            gb = g[:, jb:jb + 1]
            cols.append(ga * naa + gb * nab)         # output column ja
            cols.append(gb * nbb + ga * nab)         # output column jb
        out = jnp.concatenate(cols, axis=-1) * inv_sqrt_d            # (tb, D), lane-dense
        o_ref[...] = out.astype(o_ref.dtype)

    return kernel


# --------------------------------- wrapper ------------------------------------

def _resident_spec(shape):
    """Spec for a weight that is identical at every grid step: single-buffered."""
    nd = len(shape)
    index_map = lambda i, _nd=nd: (0,) * _nd
    try:
        return pl.BlockSpec(shape, index_map, pipeline_mode=pl.Buffered(1))
    except Exception:        # older JAX without pipeline_mode: fall back gracefully
        return pl.BlockSpec(shape, index_map)


def _pick_tb(B):
    """Batch tile: >=2 grid steps when possible (v7x megacore), multiple of 8
    sublanes, capped at 256 (v6e/v7x MXU height)."""
    if B >= 16:
        for t in (256, 128, 64, 32, 16, 8):
            if t <= B // 2 and B % t == 0:
                return t
    return B


def rspring_chain_forward(x, grad_H, params, *, tb=None, use_bf16_mxu=False):
    """Pallas implementation of RSpringChain.forward (arch='mlp')."""
    B, D = x.shape
    blocks = params['blocks']
    wf, bf = params['wf'], params['bf']
    depth = len(blocks)
    H = wf.shape[0]
    assert wf.shape[1] == D * D and D % 2 == 0
    assert grad_H.shape == (B, D)

    if tb is None:
        tb = _pick_tb(B)
    assert B % tb == 0, "batch must be divisible by the batch tile"

    if use_bf16_mxu:
        # Native MXU input rate on v6e/v7x, half the weight DMA / resident VMEM.
        # Accumulation stays f32; loosen output tolerance when enabled.
        blocks = [(W.astype(jnp.bfloat16), b, g, be) for (W, b, g, be) in blocks]
        wf = wf.astype(jnp.bfloat16)

    in_specs = [pl.BlockSpec((tb, D), lambda i: (i, 0))]
    args = [x]
    weight_bytes = 0
    for blk in blocks:
        for a in blk:
            in_specs.append(_resident_spec(a.shape))
            args.append(a)
            weight_bytes += a.size * a.dtype.itemsize
    for a in (wf, bf):
        in_specs.append(_resident_spec(a.shape))
        args.append(a)
        weight_bytes += a.size * a.dtype.itemsize
    in_specs.append(pl.BlockSpec((tb, D), lambda i: (i, 0)))
    args.append(grad_H)

    # Honest cost hints: MLP matmuls + O(B*D^2) chain work (R never hits HBM).
    mlp_flops = 2 * B * (D * H + max(depth - 1, 0) * H * H + H * D * D)
    chain_flops = B * (3 * D * D + 4 * D)
    bytes_acc = (x.size * x.dtype.itemsize + grad_H.size * grad_H.dtype.itemsize
                 + weight_bytes + B * D * 4)

    # Explicit VMEM budget (feedback): double-buffered activations/IO +
    # single-buffered weights + f32 intermediates, with generous headroom.
    act_bytes = 4 * tb * (3 * D + H + 2 * D * D)
    vmem_limit = int(min(96 * 2 ** 20, max(16 * 2 ** 20, 8 * act_bytes + 2 * weight_bytes)))

    return pl.pallas_call(
        _make_fused_kernel(depth, D, 1.0 / math.sqrt(D)),
        out_shape=jax.ShapeDtypeStruct((B, D), x.dtype),
        grid=(B // tb,),
        in_specs=in_specs,
        out_specs=pl.BlockSpec((tb, D), lambda i: (i, 0)),
        compiler_params=pltpu.CompilerParams(
            dimension_semantics=("parallel",),
            vmem_limit_bytes=vmem_limit),
        cost_estimate=pl.CostEstimate(
            flops=int(mlp_flops + chain_flops),
            transcendentals=int(B * depth * (H + 1)),
            bytes_accessed=int(bytes_acc)),
    )(*args)


# ------------------------------ pure-JAX reference ----------------------------

def rspring_chain_reference(x, grad_H, params):
    """Mirrors the PyTorch module (dense mask, dense R@R^T), high precision."""
    hp = jax.lax.Precision.HIGHEST
    B, D = x.shape
    h = x.astype(jnp.float32)
    for (W, b, g, be) in params['blocks']:
        h = jnp.dot(h, W.astype(jnp.float32), precision=hp) + b
        mu = h.mean(-1, keepdims=True)
        var = ((h - mu) ** 2).mean(-1, keepdims=True)
        h = (h - mu) / jnp.sqrt(var + 1e-5) * g + be
        h = h * jax.nn.sigmoid(h)                                   # SiLU
    r = jnp.dot(h, params['wf'].astype(jnp.float32), precision=hp) + params['bf']
    R = r.reshape(B, D, D)
    mask = jnp.zeros((D, D), jnp.float32)
    for i in range(D // 2):
        mask = mask.at[2 * i:2 * i + 2, 2 * i:2 * i + 2].set(1.0)
    M = jnp.einsum('bik,bjk->bij', R, R, precision=hp) * mask[None]
    out = jnp.einsum('bi,bij->bj', grad_H.astype(jnp.float32), M, precision=hp)
    return out / math.sqrt(D)


# ----------------------------------- demo -------------------------------------

if __name__ == "__main__":
    input_dim = 8        # D (mask has N = 4 two-by-two blocks)
    hidden_dim = 32
    depth = 2
    batch = 16           # -> tb = 8, grid = (2,): both v7x TensorCores get work

    key = jax.random.PRNGKey(0)
    keys = iter(jax.random.split(key, 4 * depth + 6))

    def lin_w(kk, fan_in, fan_out):
        bound = 1.0 / math.sqrt(fan_in)
        return jax.random.uniform(kk, (fan_in, fan_out), jnp.float32, -bound, bound)

    blocks = []
    fan_in = input_dim
    for _ in range(depth):
        W = lin_w(next(keys), fan_in, hidden_dim)
        b = jax.random.uniform(next(keys), (1, hidden_dim), jnp.float32, -0.1, 0.1)
        g = 1.0 + 0.1 * jax.random.normal(next(keys), (1, hidden_dim), jnp.float32)
        be = 0.1 * jax.random.normal(next(keys), (1, hidden_dim), jnp.float32)
        blocks.append((W, b, g, be))
        fan_in = hidden_dim
    wf = lin_w(next(keys), hidden_dim, input_dim * input_dim)
    bf = jax.random.uniform(next(keys), (1, input_dim * input_dim), jnp.float32, -0.1, 0.1)
    params = {'blocks': blocks, 'wf': wf, 'bf': bf}

    x = jax.random.normal(next(keys), (batch, input_dim), jnp.float32)
    grad_H = jax.random.normal(next(keys), (batch, input_dim), jnp.float32)

    out = rspring_chain_forward(x, grad_H, params)
    out = jax.block_until_ready(out)

    ref = rspring_chain_reference(x, grad_H, params)
    assert out.shape == (batch, input_dim), out.shape
    # Tolerance covers the TPU-generation-dependent precision of f32 MXU
    # emulation; genuine formula bugs would produce O(0.1 .. 1) errors.
    err = float(jnp.max(jnp.abs(out - ref)))
    assert err < 2e-3, f"max abs error {err}"

    print("KERNEL_OK")
</pallas_src>

<mosaic_0001>
module attributes {stable_mosaic.version = 11 : i64} {
  func.func @kernel(%arg0: i32, %arg1: memref<8x8xf32, #tpu.memory_space<vmem>>, %arg2: memref<8x32xf32, #tpu.memory_space<vmem>>, %arg3: memref<1x32xf32, #tpu.memory_space<vmem>>, %arg4: memref<1x32xf32, #tpu.memory_space<vmem>>, %arg5: memref<1x32xf32, #tpu.memory_space<vmem>>, %arg6: memref<32x32xf32, #tpu.memory_space<vmem>>, %arg7: memref<1x32xf32, #tpu.memory_space<vmem>>, %arg8: memref<1x32xf32, #tpu.memory_space<vmem>>, %arg9: memref<1x32xf32, #tpu.memory_space<vmem>>, %arg10: memref<32x64xf32, #tpu.memory_space<vmem>>, %arg11: memref<1x64xf32, #tpu.memory_space<vmem>>, %arg12: memref<8x8xf32, #tpu.memory_space<vmem>>, %arg13: memref<8x8xf32, #tpu.memory_space<vmem>>) attributes {dimension_semantics = [#tpu.dimension_semantics<parallel>], iteration_bounds = array<i64: 2>, scalar_prefetch = 0 : i64, scratch_operands = 0 : i64, tpu.core_type = #tpu.core_type<tc>, window_params = [{transform_indices = @transform_0, window_bounds = array<i64: 8, 8>}, {pipeline_mode = #tpu.pipeline_mode<synchronous>, transform_indices = @transform_1, window_bounds = array<i64: 8, 32>}, {pipeline_mode = #tpu.pipeline_mode<synchronous>, transform_indices = @transform_2, window_bounds = array<i64: 1, 32>}, {pipeline_mode = #tpu.pipeline_mode<synchronous>, transform_indices = @transform_3, window_bounds = array<i64: 1, 32>}, {pipeline_mode = #tpu.pipeline_mode<synchronous>, transform_indices = @transform_4, window_bounds = array<i64: 1, 32>}, {pipeline_mode = #tpu.pipeline_mode<synchronous>, transform_indices = @transform_5, window_bounds = array<i64: 32, 32>}, {pipeline_mode = #tpu.pipeline_mode<synchronous>, transform_indices = @transform_6, window_bounds = array<i64: 1, 32>}, {pipeline_mode = #tpu.pipeline_mode<synchronous>, transform_indices = @transform_7, window_bounds = array<i64: 1, 32>}, {pipeline_mode = #tpu.pipeline_mode<synchronous>, transform_indices = @transform_8, window_bounds = array<i64: 1, 32>}, {pipeline_mode = #tpu.pipeline_mode<synchronous>, transform_indices = @transform_9, window_bounds = array<i64: 32, 64>}, {pipeline_mode = #tpu.pipeline_mode<synchronous>, transform_indices = @transform_10, window_bounds = array<i64: 1, 64>}, {transform_indices = @transform_11, window_bounds = array<i64: 8, 8>}, {transform_indices = @transform_12, window_bounds = array<i64: 8, 8>}]} {
    %c0 = arith.constant 0 : index
    %c0_0 = arith.constant 0 : index
    %0 = vector.load %arg1[%c0, %c0_0] : memref<8x8xf32, #tpu.memory_space<vmem>>, vector<8x8xf32>
    %c0_1 = arith.constant 0 : index
    %c0_2 = arith.constant 0 : index
    %1 = vector.load %arg2[%c0_1, %c0_2] : memref<8x32xf32, #tpu.memory_space<vmem>>, vector<8x32xf32>
    %c0_3 = arith.constant 0 : index
    %c0_4 = arith.constant 0 : index
    %2 = vector.load %arg3[%c0_3, %c0_4] : memref<1x32xf32, #tpu.memory_space<vmem>>, vector<1x32xf32>
    %c0_5 = arith.constant 0 : index
    %c0_6 = arith.constant 0 : index
    %3 = vector.load %arg4[%c0_5, %c0_6] : memref<1x32xf32, #tpu.memory_space<vmem>>, vector<1x32xf32>
    %c0_7 = arith.constant 0 : index
    %c0_8 = arith.constant 0 : index
    %4 = vector.load %arg5[%c0_7, %c0_8] : memref<1x32xf32, #tpu.memory_space<vmem>>, vector<1x32xf32>
    %cst = arith.constant dense<0.000000e+00> : vector<8x32xf32>
    %5 = tpu.matmul %0, %1, %cst {dimension_numbers = #tpu.dot_dimension_numbers<[1], [0], [0], [1], [0, 0, 1, 1], [], []>} : vector<8x8xf32>, vector<8x32xf32>, vector<8x32xf32> -> vector<8x32xf32>
    %6 = vector.broadcast %2 : vector<1x32xf32> to vector<8x32xf32>
    %7 = arith.addf %5, %6 : vector<8x32xf32>
    %cst_9 = arith.constant dense<0.000000e+00> : vector<8xf32>
    %8 = vector.multi_reduction <add>, %7, %cst_9 [1] : vector<8x32xf32> to vector<8xf32>
    %9 = vector.shape_cast %8 : vector<8xf32> to vector<8x1xf32>
    %cst_10 = arith.constant 3.200000e+01 : f32
    %10 = vector.broadcast %cst_10 : f32 to vector<8x1xf32>
    %11 = arith.divf %9, %10 : vector<8x1xf32>
    %12 = vector.broadcast %11 : vector<8x1xf32> to vector<8x32xf32>
    %13 = arith.subf %7, %12 : vector<8x32xf32>
    %14 = arith.mulf %13, %13 : vector<8x32xf32>
    %cst_11 = arith.constant dense<0.000000e+00> : vector<8xf32>
    %15 = vector.multi_reduction <add>, %14, %cst_11 [1] : vector<8x32xf32> to vector<8xf32>
    %16 = vector.shape_cast %15 : vector<8xf32> to vector<8x1xf32>
    %cst_12 = arith.constant 3.200000e+01 : f32
    %17 = vector.broadcast %cst_12 : f32 to vector<8x1xf32>
    %18 = arith.divf %16, %17 : vector<8x1xf32>
    %cst_13 = arith.constant 9.99999974E-6 : f32
    %19 = vector.broadcast %cst_13 : f32 to vector<8x1xf32>
    %20 = arith.addf %18, %19 : vector<8x1xf32>
    %21 = math.rsqrt %20 : vector<8x1xf32>
    %22 = vector.broadcast %21 : vector<8x1xf32> to vector<8x32xf32>
    %23 = arith.mulf %13, %22 : vector<8x32xf32>
    %24 = vector.broadcast %3 : vector<1x32xf32> to vector<8x32xf32>
    %25 = arith.mulf %23, %24 : vector<8x32xf32>
    %26 = vector.broadcast %4 : vector<1x32xf32> to vector<8x32xf32>
    %27 = arith.addf %25, %26 : vector<8x32xf32>
    %cst_14 = arith.constant 5.000000e-01 : f32
    %28 = vector.broadcast %cst_14 : f32 to vector<8x32xf32>
    %29 = arith.mulf %28, %27 : vector<8x32xf32>
    %30 = math.tanh %29 : vector<8x32xf32>
    %cst_15 = arith.constant 5.000000e-01 : f32
    %31 = vector.broadcast %cst_15 : f32 to vector<8x32xf32>
    %32 = arith.mulf %31, %30 : vector<8x32xf32>
    %cst_16 = arith.constant 5.000000e-01 : f32
    %33 = vector.broadcast %cst_16 : f32 to vector<8x32xf32>
    %34 = arith.addf %32, %33 : vector<8x32xf32>
    %35 = arith.mulf %27, %34 : vector<8x32xf32>
    %c0_17 = arith.constant 0 : index
    %c0_18 = arith.constant 0 : index
    %36 = vector.load %arg6[%c0_17, %c0_18] : memref<32x32xf32, #tpu.memory_space<vmem>>, vector<32x32xf32>
    %c0_19 = arith.constant 0 : index
    %c0_20 = arith.constant 0 : index
    %37 = vector.load %arg7[%c0_19, %c0_20] : memref<1x32xf32, #tpu.memory_space<vmem>>, vector<1x32xf32>
    %c0_21 = arith.constant 0 : index
    %c0_22 = arith.constant 0 : index
    %38 = vector.load %arg8[%c0_21, %c0_22] : memref<1x32xf32, #tpu.memory_space<vmem>>, vector<1x32xf32>
    %c0_23 = arith.constant 0 : index
    %c0_24 = arith.constant 0 : index
    %39 = vector.load %arg9[%c0_23, %c0_24] : memref<1x32xf32, #tpu.memory_space<vmem>>, vector<1x32xf32>
    %cst_25 = arith.constant dense<0.000000e+00> : vector<8x32xf32>
    %40 = tpu.matmul %35, %36, %cst_25 {dimension_numbers = #tpu.dot_dimension_numbers<[1], [0], [0], [1], [0, 0, 1, 1], [], []>} : vector<8x32xf32>, vector<32x32xf32>, vector<8x32xf32> -> vector<8x32xf32>
    %41 = vector.broadcast %37 : vector<1x32xf32> to vector<8x32xf32>
    %42 = arith.addf %40, %41 : vector<8x32xf32>
    %cst_26 = arith.constant dense<0.000000e+00> : vector<8xf32>
    %43 = vector.multi_reduction <add>, %42, %cst_26 [1] : vector<8x32xf32> to vector<8xf32>
    %44 = vector.shape_cast %43 : vector<8xf32> to vector<8x1xf32>
    %cst_27 = arith.constant 3.200000e+01 : f32
    %45 = vector.broadcast %cst_27 : f32 to vector<8x1xf32>
    %46 = arith.divf %44, %45 : vector<8x1xf32>
    %47 = vector.broadcast %46 : vector<8x1xf32> to vector<8x32xf32>
    %48 = arith.subf %42, %47 : vector<8x32xf32>
    %49 = arith.mulf %48, %48 : vector<8x32xf32>
    %cst_28 = arith.constant dense<0.000000e+00> : vector<8xf32>
    %50 = vector.multi_reduction <add>, %49, %cst_28 [1] : vector<8x32xf32> to vector<8xf32>
    %51 = vector.shape_cast %50 : vector<8xf32> to vector<8x1xf32>
    %cst_29 = arith.constant 3.200000e+01 : f32
    %52 = vector.broadcast %cst_29 : f32 to vector<8x1xf32>
    %53 = arith.divf %51, %52 : vector<8x1xf32>
    %cst_30 = arith.constant 9.99999974E-6 : f32
    %54 = vector.broadcast %cst_30 : f32 to vector<8x1xf32>
    %55 = arith.addf %53, %54 : vector<8x1xf32>
    %56 = math.rsqrt %55 : vector<8x1xf32>
    %57 = vector.broadcast %56 : vector<8x1xf32> to vector<8x32xf32>
    %58 = arith.mulf %48, %57 : vector<8x32xf32>
    %59 = vector.broadcast %38 : vector<1x32xf32> to vector<8x32xf32>
    %60 = arith.mulf %58, %59 : vector<8x32xf32>
    %61 = vector.broadcast %39 : vector<1x32xf32> to vector<8x32xf32>
    %62 = arith.addf %60, %61 : vector<8x32xf32>
    %cst_31 = arith.constant 5.000000e-01 : f32
    %63 = vector.broadcast %cst_31 : f32 to vector<8x32xf32>
    %64 = arith.mulf %63, %62 : vector<8x32xf32>
    %65 = math.tanh %64 : vector<8x32xf32>
    %cst_32 = arith.constant 5.000000e-01 : f32
    %66 = vector.broadcast %cst_32 : f32 to vector<8x32xf32>
    %67 = arith.mulf %66, %65 : vector<8x32xf32>
    %cst_33 = arith.constant 5.000000e-01 : f32
    %68 = vector.broadcast %cst_33 : f32 to vector<8x32xf32>
    %69 = arith.addf %67, %68 : vector<8x32xf32>
    %70 = arith.mulf %62, %69 : vector<8x32xf32>
    %c0_34 = arith.constant 0 : index
    %c0_35 = arith.constant 0 : index
    %71 = vector.load %arg10[%c0_34, %c0_35] : memref<32x64xf32, #tpu.memory_space<vmem>>, vector<32x64xf32>
    %c0_36 = arith.constant 0 : index
    %c0_37 = arith.constant 0 : index
    %72 = vector.load %arg11[%c0_36, %c0_37] : memref<1x64xf32, #tpu.memory_space<vmem>>, vector<1x64xf32>
    %cst_38 = arith.constant dense<0.000000e+00> : vector<8x64xf32>
    %73 = tpu.matmul %70, %71, %cst_38 {dimension_numbers = #tpu.dot_dimension_numbers<[1], [0], [0], [1], [0, 0, 1, 1], [], []>} : vector<8x32xf32>, vector<32x64xf32>, vector<8x64xf32> -> vector<8x64xf32>
    %74 = vector.broadcast %72 : vector<1x64xf32> to vector<8x64xf32>
    %75 = arith.addf %73, %74 : vector<8x64xf32>
    %c0_39 = arith.constant 0 : index
    %c0_40 = arith.constant 0 : index
    %76 = vector.load %arg12[%c0_39, %c0_40] : memref<8x8xf32, #tpu.memory_space<vmem>>, vector<8x8xf32>
    %77 = vector.extract_strided_slice %75 {offsets = [0, 0], sizes = [8, 8], strides = [1, 1]} : vector<8x64xf32> to vector<8x8xf32>
    %78 = vector.extract_strided_slice %75 {offsets = [0, 8], sizes = [8, 8], strides = [1, 1]} : vector<8x64xf32> to vector<8x8xf32>
    %79 = arith.mulf %77, %77 : vector<8x8xf32>
    %cst_41 = arith.constant dense<0.000000e+00> : vector<8xf32>
    %80 = vector.multi_reduction <add>, %79, %cst_41 [1] : vector<8x8xf32> to vector<8xf32>
    %81 = vector.shape_cast %80 : vector<8xf32> to vector<8x1xf32>
    %82 = arith.mulf %78, %78 : vector<8x8xf32>
    %cst_42 = arith.constant dense<0.000000e+00> : vector<8xf32>
    %83 = vector.multi_reduction <add>, %82, %cst_42 [1] : vector<8x8xf32> to vector<8xf32>
    %84 = vector.shape_cast %83 : vector<8xf32> to vector<8x1xf32>
    %85 = arith.mulf %77, %78 : vector<8x8xf32>
    %cst_43 = arith.constant dense<0.000000e+00> : vector<8xf32>
    %86 = vector.multi_reduction <add>, %85, %cst_43 [1] : vector<8x8xf32> to vector<8xf32>
    %87 = vector.shape_cast %86 : vector<8xf32> to vector<8x1xf32>
    %88 = vector.extract_strided_slice %76 {offsets = [0, 0], sizes = [8, 1], strides = [1, 1]} : vector<8x8xf32> to vector<8x1xf32>
    %89 = vector.extract_strided_slice %76 {offsets = [0, 1], sizes = [8, 1], strides = [1, 1]} : vector<8x8xf32> to vector<8x1xf32>
    %90 = arith.mulf %88, %81 : vector<8x1xf32>
    %91 = arith.mulf %89, %87 : vector<8x1xf32>
    %92 = arith.addf %90, %91 : vector<8x1xf32>
    %93 = arith.mulf %89, %84 : vector<8x1xf32>
    %94 = arith.mulf %88, %87 : vector<8x1xf32>
    %95 = arith.addf %93, %94 : vector<8x1xf32>
    %96 = vector.extract_strided_slice %75 {offsets = [0, 16], sizes = [8, 8], strides = [1, 1]} : vector<8x64xf32> to vector<8x8xf32>
    %97 = vector.extract_strided_slice %75 {offsets = [0, 24], sizes = [8, 8], strides = [1, 1]} : vector<8x64xf32> to vector<8x8xf32>
    %98 = arith.mulf %96, %96 : vector<8x8xf32>
    %cst_44 = arith.constant dense<0.000000e+00> : vector<8xf32>
    %99 = vector.multi_reduction <add>, %98, %cst_44 [1] : vector<8x8xf32> to vector<8xf32>
    %100 = vector.shape_cast %99 : vector<8xf32> to vector<8x1xf32>
    %101 = arith.mulf %97, %97 : vector<8x8xf32>
    %cst_45 = arith.constant dense<0.000000e+00> : vector<8xf32>
    %102 = vector.multi_reduction <add>, %101, %cst_45 [1] : vector<8x8xf32> to vector<8xf32>
    %103 = vector.shape_cast %102 : vector<8xf32> to vector<8x1xf32>
    %104 = arith.mulf %96, %97 : vector<8x8xf32>
    %cst_46 = arith.constant dense<0.000000e+00> : vector<8xf32>
    %105 = vector.multi_reduction <add>, %104, %cst_46 [1] : vector<8x8xf32> to vector<8xf32>
    %106 = vector.shape_cast %105 : vector<8xf32> to vector<8x1xf32>
    %107 = vector.extract_strided_slice %76 {offsets = [0, 2], sizes = [8, 1], strides = [1, 1]} : vector<8x8xf32> to vector<8x1xf32>
    %108 = vector.extract_strided_slice %76 {offsets = [0, 3], sizes = [8, 1], strides = [1, 1]} : vector<8x8xf32> to vector<8x1xf32>
    %109 = arith.mulf %107, %100 : vector<8x1xf32>
    %110 = arith.mulf %108, %106 : vector<8x1xf32>
    %111 = arith.addf %109, %110 : vector<8x1xf32>
    %112 = arith.mulf %108, %103 : vector<8x1xf32>
    %113 = arith.mulf %107, %106 : vector<8x1xf32>
    %114 = arith.addf %112, %113 : vector<8x1xf32>
    %115 = vector.extract_strided_slice %75 {offsets = [0, 32], sizes = [8, 8], strides = [1, 1]} : vector<8x64xf32> to vector<8x8xf32>
    %116 = vector.extract_strided_slice %75 {offsets = [0, 40], sizes = [8, 8], strides = [1, 1]} : vector<8x64xf32> to vector<8x8xf32>
    %117 = arith.mulf %115, %115 : vector<8x8xf32>
    %cst_47 = arith.constant dense<0.000000e+00> : vector<8xf32>
    %118 = vector.multi_reduction <add>, %117, %cst_47 [1] : vector<8x8xf32> to vector<8xf32>
    %119 = vector.shape_cast %118 : vector<8xf32> to vector<8x1xf32>
    %120 = arith.mulf %116, %116 : vector<8x8xf32>
    %cst_48 = arith.constant dense<0.000000e+00> : vector<8xf32>
    %121 = vector.multi_reduction <add>, %120, %cst_48 [1] : vector<8x8xf32> to vector<8xf32>
    %122 = vector.shape_cast %121 : vector<8xf32> to vector<8x1xf32>
    %123 = arith.mulf %115, %116 : vector<8x8xf32>
    %cst_49 = arith.constant dense<0.000000e+00> : vector<8xf32>
    %124 = vector.multi_reduction <add>, %123, %cst_49 [1] : vector<8x8xf32> to vector<8xf32>
    %125 = vector.shape_cast %124 : vector<8xf32> to vector<8x1xf32>
    %126 = vector.extract_strided_slice %76 {offsets = [0, 4], sizes = [8, 1], strides = [1, 1]} : vector<8x8xf32> to vector<8x1xf32>
    %127 = vector.extract_strided_slice %76 {offsets = [0, 5], sizes = [8, 1], strides = [1, 1]} : vector<8x8xf32> to vector<8x1xf32>
    %128 = arith.mulf %126, %119 : vector<8x1xf32>
    %129 = arith.mulf %127, %125 : vector<8x1xf32>
    %130 = arith.addf %128, %129 : vector<8x1xf32>
    %131 = arith.mulf %127, %122 : vector<8x1xf32>
    %132 = arith.mulf %126, %125 : vector<8x1xf32>
    %133 = arith.addf %131, %132 : vector<8x1xf32>
    %134 = vector.extract_strided_slice %75 {offsets = [0, 48], sizes = [8, 8], strides = [1, 1]} : vector<8x64xf32> to vector<8x8xf32>
    %135 = vector.extract_strided_slice %75 {offsets = [0, 56], sizes = [8, 8], strides = [1, 1]} : vector<8x64xf32> to vector<8x8xf32>
    %136 = arith.mulf %134, %134 : vector<8x8xf32>
    %cst_50 = arith.constant dense<0.000000e+00> : vector<8xf32>
    %137 = vector.multi_reduction <add>, %136, %cst_50 [1] : vector<8x8xf32> to vector<8xf32>
    %138 = vector.shape_cast %137 : vector<8xf32> to vector<8x1xf32>
    %139 = arith.mulf %135, %135 : vector<8x8xf32>
    %cst_51 = arith.constant dense<0.000000e+00> : vector<8xf32>
    %140 = vector.multi_reduction <add>, %139, %cst_51 [1] : vector<8x8xf32> to vector<8xf32>
    %141 = vector.shape_cast %140 : vector<8xf32> to vector<8x1xf32>
    %142 = arith.mulf %134, %135 : vector<8x8xf32>
    %cst_52 = arith.constant dense<0.000000e+00> : vector<8xf32>
    %143 = vector.multi_reduction <add>, %142, %cst_52 [1] : vector<8x8xf32> to vector<8xf32>
    %144 = vector.shape_cast %143 : vector<8xf32> to vector<8x1xf32>
    %145 = vector.extract_strided_slice %76 {offsets = [0, 6], sizes = [8, 1], strides = [1, 1]} : vector<8x8xf32> to vector<8x1xf32>
    %146 = vector.extract_strided_slice %76 {offsets = [0, 7], sizes = [8, 1], strides = [1, 1]} : vector<8x8xf32> to vector<8x1xf32>
    %147 = arith.mulf %145, %138 : vector<8x1xf32>
    %148 = arith.mulf %146, %144 : vector<8x1xf32>
    %149 = arith.addf %147, %148 : vector<8x1xf32>
    %150 = arith.mulf %146, %141 : vector<8x1xf32>
    %151 = arith.mulf %145, %144 : vector<8x1xf32>
    %152 = arith.addf %150, %151 : vector<8x1xf32>
    %153 = tpu.concatenate %92, %95, %111, %114, %130, %133, %149, %152 in 1 : vector<8x1xf32>, vector<8x1xf32>, vector<8x1xf32>, vector<8x1xf32>, vector<8x1xf32>, vector<8x1xf32>, vector<8x1xf32>, vector<8x1xf32> -> vector<8x8xf32>
    %cst_53 = arith.constant 0.353553385 : f32
    %154 = vector.broadcast %cst_53 : f32 to vector<8x8xf32>
    %155 = arith.mulf %153, %154 : vector<8x8xf32>
    %c0_54 = arith.constant 0 : index
    %c0_55 = arith.constant 0 : index
    %156 = vector.load %arg13[%c0_54, %c0_55] : memref<8x8xf32, #tpu.memory_space<vmem>>, vector<8x8xf32>
    tpu.vector_store %arg13[%c0_54, %c0_55], %155 {strides = array<i32>} : memref<8x8xf32, #tpu.memory_space<vmem>>, vector<8x8xf32>,
    return
  }
  func.func @transform_0(%arg0: i32) -> (i32, i32) {
    %c0_i32 = arith.constant 0 : i32
    %c0_i32_0 = arith.constant 0 : i32
    return %arg0, %c0_i32 : i32, i32
  }
  func.func @transform_1(%arg0: i32) -> (i32, i32) {
    %c0_i32 = arith.constant 0 : i32
    %c0_i32_0 = arith.constant 0 : i32
    %c0_i32_1 = arith.constant 0 : i32
    return %c0_i32, %c0_i32_0 : i32, i32
  }
  func.func @transform_2(%arg0: i32) -> (i32, i32) {
    %c0_i32 = arith.constant 0 : i32
    %c0_i32_0 = arith.constant 0 : i32
    %c0_i32_1 = arith.constant 0 : i32
    return %c0_i32, %c0_i32_0 : i32, i32
  }
  func.func @transform_3(%arg0: i32) -> (i32, i32) {
    %c0_i32 = arith.constant 0 : i32
    %c0_i32_0 = arith.constant 0 : i32
    %c0_i32_1 = arith.constant 0 : i32
    return %c0_i32, %c0_i32_0 : i32, i32
  }
  func.func @transform_4(%arg0: i32) -> (i32, i32) {
    %c0_i32 = arith.constant 0 : i32
    %c0_i32_0 = arith.constant 0 : i32
    %c0_i32_1 = arith.constant 0 : i32
    return %c0_i32, %c0_i32_0 : i32, i32
  }
  func.func @transform_5(%arg0: i32) -> (i32, i32) {
    %c0_i32 = arith.constant 0 : i32
    %c0_i32_0 = arith.constant 0 : i32
    %c0_i32_1 = arith.constant 0 : i32
    return %c0_i32, %c0_i32_0 : i32, i32
  }
  func.func @transform_6(%arg0: i32) -> (i32, i32) {
    %c0_i32 = arith.constant 0 : i32
    %c0_i32_0 = arith.constant 0 : i32
    %c0_i32_1 = arith.constant 0 : i32
    return %c0_i32, %c0_i32_0 : i32, i32
  }
  func.func @transform_7(%arg0: i32) -> (i32, i32) {
    %c0_i32 = arith.constant 0 : i32
    %c0_i32_0 = arith.constant 0 : i32
    %c0_i32_1 = arith.constant 0 : i32
    return %c0_i32, %c0_i32_0 : i32, i32
  }
  func.func @transform_8(%arg0: i32) -> (i32, i32) {
    %c0_i32 = arith.constant 0 : i32
    %c0_i32_0 = arith.constant 0 : i32
    %c0_i32_1 = arith.constant 0 : i32
    return %c0_i32, %c0_i32_0 : i32, i32
  }
  func.func @transform_9(%arg0: i32) -> (i32, i32) {
    %c0_i32 = arith.constant 0 : i32
    %c0_i32_0 = arith.constant 0 : i32
    %c0_i32_1 = arith.constant 0 : i32
    return %c0_i32, %c0_i32_0 : i32, i32
  }
  func.func @transform_10(%arg0: i32) -> (i32, i32) {
    %c0_i32 = arith.constant 0 : i32
    %c0_i32_0 = arith.constant 0 : i32
    %c0_i32_1 = arith.constant 0 : i32
    return %c0_i32, %c0_i32_0 : i32, i32
  }
  func.func @transform_11(%arg0: i32) -> (i32, i32) {
    %c0_i32 = arith.constant 0 : i32
    %c0_i32_0 = arith.constant 0 : i32
    return %arg0, %c0_i32 : i32, i32
  }
  func.func @transform_12(%arg0: i32) -> (i32, i32) {
    %c0_i32 = arith.constant 0 : i32
    %c0_i32_0 = arith.constant 0 : i32
    return %arg0, %c0_i32 : i32, i32
  }
}

</mosaic_0001>

<bundles_post_ra>
// kernel: tpu_custom_call.1
= control target key start
LH: loop header
LB: loop body
LE: loop exit
PB: predicated region body
PF: predicated region fallthrough
CT: control target
= control target key end

     0   :  { %17 = vsyncpa [#allocation3], 0  ;;  %s1617_s0 = inlined_call_operand.vmem [shape: f32[16,8], index: 0, kind: input, shape index: {}]   ;;  %s1618_s1 = inlined_call_operand.hbm [shape: f32[8,32], index: 1, kind: input, shape index: {}]   ;;  %s1619_s2 = inlined_call_operand.vmem [shape: f32[1,32], index: 2, kind: input, shape index: {}]   ;;  %s1620_s3 = inlined_call_operand.vmem [shape: f32[1,32], index: 3, kind: input, shape index: {}]   ;;  %s1621_s4 = inlined_call_operand.hbm [shape: f32[1,32], index: 4, kind: input, shape index: {}]   ;;  %s1622_s5 = inlined_call_operand.vmem [shape: f32[32,32], index: 5, kind: input, shape index: {}]   ;;  %s1623_s6 = inlined_call_operand.hbm [shape: f32[1,32], index: 6, kind: input, shape index: {}]   ;;  %s1624_s7 = inlined_call_operand.hbm [shape: f32[1,32], index: 7, kind: input, shape index: {}]   ;;  %s1625_s8 = inlined_call_operand.vmem [shape: f32[1,32], index: 8, kind: input, shape index: {}]   ;;  %s1626_s9 = inlined_call_operand.vmem [shape: f32[32,64], index: 9, kind: input, shape index: {}]   ;;  %s1627_s10 = inlined_call_operand.vmem [shape: f32[1,64], index: 10, kind: input, shape index: {}]   ;;  %s1628_s11 = inlined_call_operand.vmem [shape: f32[16,8], index: 11, kind: input, shape index: {}]   ;;  %s1629_s12 = inlined_call_operand.vmem [shape: f32[16,8], index: 12, kind: output, shape index: {}]  }
   0x1   :  { %18 = vsyncpa [#allocation5], 0 }
   0x2   :  { %19 = vsyncpa [#allocation8], 0  ;;  %s1404_s21 = smov 0  }
   0x3 LB: > { %s1410_s22 = sadd.s32 4294967295, %s1321_s21   ;;  %p1045_p0 = scmp.ge.s32.totalorder %s1321_s21, 1  ;;  %s1321_s21 = sphi %s1404_s21, %s25_s21  }
   0x4   : > { %p318_p1 = scmp.lt.s32.totalorder %s1321_s21, 3  ;;  %p1630_p2 = scmp.eq.s32.totalorder %s1410_s22, 0 }
   0x5   : > { %s1323_s23 = smov [#allocation4]   ;;  %s1324_s26 = smov [#allocation2]  }
   0x6   : > { %s348_s24 = sshll.u32 %s1323_s23, 4  ;;  %p1415_p3 = pnand %p1045_p0, %p318_p1  ;;  %s349_s24 = int_to_ptr.vmem [resolvable:$true] %s348_s24 }
   0x7   : > { %s331_s27 = sshll.u32 %s1324_s26, 4  ;;  %s1325_s28 = smov [#allocation6]   ;;  %s1427_s27 = int_to_ptr.vmem [resolvable:$true] %s331_s27 }
   0x8   : > { %s1632_s25 = scalar_select %p1415_p3, 1, 0 }
   0x9   : > { %p1138_p4 = pneg %p1415_p3  ;;  %s362_s29 = sshll.u32 %s1325_s28, 4  ;;  %s1429_s29 = int_to_ptr.vmem [resolvable:$true] %s362_s29 }
   0xa   : > { %s1326_s13 = smov [#allocation7]   ;;  %s1191_s17 = scalar_lea.hbm %s1621_s4, 16 }
   0xb   : > { %p1423_p5 = pnand %p1630_p2, %p1138_p4  ;;  %s373_s14 = sshll.u32 %s1326_s13, 4  ;;  %s1431_s14 = int_to_ptr.vmem [resolvable:$true] %s373_s14 }
   0xc   : > { %p1192_p6 = scmp.ne.s32.totalorder %s1621_s4, %s1191_s17  ;;  %p1198_p10 = scmp.lt.u32.totalorder %s1191_s17, %s1621_s4 }
   0xd   : > { %p1441_p7 = pneg %p1423_p5 }
   0xf   : > { %p1194_p8 = pnand %p1441_p7, %p1192_p6 }
  0x11   : > { %p1195_p9 = pneg %p1194_p8 }
  0x13   : > { %p1200_p11 = pnand %p1198_p10, %p1195_p9 }
  0x15   : > { %1203 = shalt.err (!%p1200_p11)
}
  0x16   : > { %s1204_s28 = scalar_lea.vmem %s349_s24, 16  ;;  %s1211_s13 = scalar_lea.vmem %s349_s24, 32 }
  0x17   : > { %p1205_p12 = scmp.ne.s32.totalorder %s349_s24, %s1204_s28  ;;  %p1212_p1 = scmp.lt.s32.totalorder %s349_s24, %s349_s24 }
  0x18   : > { %p1213_p4 = scmp.lt.s32.totalorder %s1211_s13, %s1204_s28 }
  0x19   : > { %p1207_p13 = pnand %p1205_p12, %p1441_p7 }
  0x1a   : > { %p1214_p2 = por %p1213_p4, %p1212_p1 }
  0x1b   : > { %p1208_p0 = pneg %p1207_p13 }
  0x1d   : > { %p1215_p3 = pnand %p1214_p2, %p1208_p0 }
  0x1f   : > { %1218 = shalt.err (!%p1215_p3)
}
  0x20   : > { %1144 = dma.hbm_to_vmem [thread:$0]  (!%p1423_p5), %s1621_s4, 16, %s349_s24, [#allocation5]  }
  0x21   : > { %s1219_s19 = scalar_lea.hbm %s1618_s1, 128 }
  0x22   : > { %p1220_p6 = scmp.ne.s32.totalorder %s1618_s1, %s1219_s19  ;;  %p1226_p2 = scmp.lt.u32.totalorder %s1219_s19, %s1618_s1 }
  0x24   : > { %p1222_p8 = pnand %p1220_p6, %p1441_p7 }
  0x26   : > { %p1223_p9 = pneg %p1222_p8 }
  0x28   : > { %p1228_p3 = pnand %p1226_p2, %p1223_p9 }
  0x2a   : > { %1231 = shalt.err (!%p1228_p3)
}
  0x2b   : > { %s1232_s24 = scalar_lea.vmem %s1427_s27, 128  ;;  %p1240_p13 = scmp.lt.s32.totalorder %s1427_s27, %s1427_s27 }
  0x2c   : > { %p1233_p10 = scmp.ne.s32.totalorder %s1427_s27, %s1232_s24  ;;  %p1241_p0 = scmp.lt.s32.totalorder %s1232_s24, %s1232_s24 }
  0x2e   : > { %p1235_p11 = pnand %p1233_p10, %p1441_p7  ;;  %p1242_p1 = por %p1241_p0, %p1240_p13 }
  0x30   : > { %p1236_p12 = pneg %p1235_p11 }
  0x32   : > { %p1243_p4 = pnand %p1242_p1, %p1236_p12 }
  0x34   : > { %1246 = shalt.err (!%p1243_p4)
}
  0x35   : > { %1141 = dma.hbm_to_vmem [thread:$0]  (!%p1423_p5), %s1618_s1, 128, %s1427_s27, [#allocation3]  }
  0x36   : > { %s1247_s19 = scalar_lea.hbm %s1623_s6, 16 }
  0x37   : > { %p1248_p6 = scmp.ne.s32.totalorder %s1623_s6, %s1247_s19  ;;  %p1254_p2 = scmp.lt.u32.totalorder %s1247_s19, %s1623_s6 }
  0x39   : > { %p1250_p8 = pnand %p1248_p6, %p1441_p7 }
  0x3b   : > { %p1251_p9 = pneg %p1250_p8 }
  0x3d   : > { %p1256_p3 = pnand %p1254_p2, %p1251_p9 }
  0x3f   : > { %1259 = shalt.err (!%p1256_p3)
}
  0x40   : > { %s1260_s27 = scalar_lea.vmem %s1429_s29, 16  ;;  %s1267_s24 = scalar_lea.vmem %s1429_s29, 32 }
  0x41   : > { %p1261_p10 = scmp.ne.s32.totalorder %s1429_s29, %s1260_s27  ;;  %p1268_p13 = scmp.lt.s32.totalorder %s1429_s29, %s1429_s29 }
  0x42   : > { %p1269_p0 = scmp.lt.s32.totalorder %s1267_s24, %s1260_s27 }
  0x43   : > { %p1263_p11 = pnand %p1261_p10, %p1441_p7 }
  0x44   : > { %p1270_p1 = por %p1269_p0, %p1268_p13 }
  0x45   : > { %p1264_p12 = pneg %p1263_p11 }
  0x47   : > { %p1271_p4 = pnand %p1270_p1, %p1264_p12 }
  0x49   : > { %1274 = shalt.err (!%p1271_p4)
}
  0x4a   : > { %1147 = dma.hbm_to_vmem [thread:$0]  (!%p1423_p5), %s1623_s6, 16, %s1429_s29, [#allocation5]  }
  0x4b   : > { %s1275_s19 = scalar_lea.hbm %s1624_s7, 16 }
  0x4c   : > { %p1276_p6 = scmp.ne.s32.totalorder %s1624_s7, %s1275_s19  ;;  %p1282_p2 = scmp.lt.u32.totalorder %s1275_s19, %s1624_s7 }
  0x4e   : > { %p1278_p8 = pnand %p1276_p6, %p1441_p7 }
  0x50   : > { %p1279_p9 = pneg %p1278_p8 }
  0x52   : > { %p1284_p3 = pnand %p1282_p2, %p1279_p9 }
  0x54   : > { %1287 = shalt.err (!%p1284_p3)
}
  0x55   : > { %s1288_s29 = scalar_lea.vmem %s1431_s14, 16  ;;  %s1295_s27 = scalar_lea.vmem %s1431_s14, 32 }
  0x56   : > { %p1289_p10 = scmp.ne.s32.totalorder %s1431_s14, %s1288_s29  ;;  %p1296_p13 = scmp.lt.s32.totalorder %s1431_s14, %s1431_s14 }
  0x57   : > { %p1297_p0 = scmp.lt.s32.totalorder %s1295_s27, %s1288_s29 }
  0x58   : > { %p1291_p11 = pnand %p1289_p10, %p1441_p7 }
  0x59   : > { %p1298_p1 = por %p1297_p0, %p1296_p13 }
  0x5a   : > { %p1292_p12 = pneg %p1291_p11 }
  0x5c   : > { %p1299_p4 = pnand %p1298_p1, %p1292_p12 }
  0x5e   : > { %1302 = shalt.err (!%p1299_p4)
}
  0x5f   : > { %1150 = dma.hbm_to_vmem [thread:$0]  (!%p1423_p5), %s1624_s7, 16, %s1431_s14, [#allocation8]  }
  0x60   : > { %p1635_p6 = scmp.ne.s32.totalorder %s1632_s25, 0 }
  0x61   : > { %p1636_p7 = scmp.eq.s32.totalorder (!%p1635_p6), %s1410_s22, 0 }
  0x62   : > { %409 = sbr.rel (%p1635_p6) target bundleno = 1935 (0x78f), region = 68 }
  0x69   : > { %1308 = dma.done.wait (%p1636_p7), [#allocation3], 128   ;;  %p1637_p8 = pmov %p1636_p7 }
  0x6a   : > { %p1638_p9 = pmov %p1636_p7 }
  0x6b   : > { %1310 = vsyncadd (%p1637_p8), [#allocation3], 4294967168 }
  0x6c   : > { %1312 = dma.done.wait (%p1638_p9), [#allocation5], 32   ;;  %p1639_p2 = pmov %p1636_p7 }
  0x6e   : > { %1314 = vsyncadd (%p1639_p2), [#allocation5], 4294967264  ;;  %p1640_p3 = pmov %p1639_p2 }
  0x6f   : > { %p1641_p5 = pmov %p1639_p2 }
  0x70   : > { %1316 = dma.done.wait (%p1640_p3), [#allocation8], 16  }
  0x71   : > { %1318 = vsyncadd (%p1641_p5), [#allocation8], 4294967280  ;;  %p465_p10 = scmp.lt.s32.totalorder %s1410_s22, 1  ;;  %v1327_v0 = vmov 0.0   ;;  %vm1328_vm0 = vmmov 0   ;;  %vm488_vm1 = vcmask 64512  }
  0x72   : > { %1083 = vmatprep.subr.mxu0 %v1327_v0  ;;  %1085 = vmatprep.mubr.msk.f32.mxu0 %vm1328_vm0, %v1327_v0  ;;  %v478_v1 = vld [vmem:[#allocation2] sm:$0xff]  ;;  %vm562_vm2 = vcmask 261120   ;;  %v597_v14 = vld [vmem:[%s1622_s5 + $0x8] sm:$0xff]  ;;  %v598_v15 = vld [vmem:[%s1622_s5 + $0x10] sm:$0xff]  ;;  %v1329_v16 = vmov 0.0|0.0   ;;  %s1330_s13 = smov 120  }
  0x73   : > { %s1643_s22 = smov (!%p465_p10, %s1410_s22), 1  ;;  %1096 = vmatprep.mubr.msk.f32.mxu1 %vm1328_vm0, %v1327_v0  ;;  %1084 = vmatpush3.msra.mxu0 %v478_v1  ;;  %v1059_v3 = vld [vmem:[%s1619_s2] ss:$0 sm:$0xff]  ;;  %v599_v18 = vld [vmem:[%s1622_s5 + $0x18] sm:$0xff]  ;;  %v1062_v26 = vld [vmem:[#allocation4] ss:$0 sm:$0xff] }
  0x74   : > { %s1544_s25 = sshll.u32 %s1643_s22, 3  ;;  %v596_v13 = vld [vmem:[%s1622_s5] sm:$0xff]  ;;  %1110 = vmatprep.subr.bf16.mxu1 %v1329_v16  ;;  %1116 = vmatprep.subr.bf16.mxu0 %v1329_v16  ;;  %v1114_v19 = vpack.c.bf16 %v599_v18, %v598_v15  ;;  %v1063_v34 = vld [vmem:[#allocation6] ss:$0 sm:$0xff]  ;;  %v716_v46 = vld [vmem:[%s1626_s9 + $0x10] sm:$0xff]  ;;  %s1331_s29 = smov 112  }
  0x75   : > { %s468_s20 = scalar_lea.vmem %s1617_s0, %s1544_s25  ;;  %v1111_v17 = vpack.c.bf16 %v597_v14, %v596_v13  ;;  %v1061_v24 = vld [vmem:[%s1620_s3] ss:$0 sm:$0xff]  ;;  %v715_v45 = vld [vmem:[%s1626_s9 + $0x8] sm:$0xff]  ;;  %v717_v48 = vld [vmem:[%s1626_s9 + $0x18] sm:$0xff]  ;;  %s1332_s27 = smov 104   ;;  %vm921_vm3 = vcmask 7168  }
  0x76   : > { %v477_v2 = vld [vmem:[%s468_s20] sm:$0xff]  ;;  %v1120_v49 = vpack.c.bf16 %v717_v48, %v716_v46  ;;  %v1065_v54 = vld [vmem:[#allocation7] ss:$0 sm:$0xff]  ;;  %s1333_s24 = smov 96   ;;  %s1334_s15 = smov 80   ;;  %vm923_vm4 = vcmask 15360  }
  0x77   : > { %1086 = vmatmul.mubr.msk.f32.vlgmr.msra.gmra.mrb[0].mxu0 %vm488_vm1, %v477_v2  ;;  %1112 = vmatpush3.bf16.msra.mxu1 %v1111_v17  ;;  %v714_v44 = vld [vmem:[%s1626_s9] sm:$0xff]  ;;  %s1335_s30 = smov 88   ;;  %s1336_s14 = smov 72   ;;  %vm925_vm5 = vcmask 23552   ;;  %vm927_vm6 = vcmask 31744   ;;  %vm929_vm7 = vcmask 39936  }
  0x78   : > { %1107 = vmatprep.mubr.msk.f32.mxu0 %vm1328_vm0, %v1327_v0  ;;  %1113 = vmatprep.subr.bf16.mxu1 %v1329_v16  ;;  %v1117_v47 = vpack.c.bf16 %v715_v45, %v714_v44  ;;  %v1066_v56 = vld [vmem:[%s1625_s8] ss:$0 sm:$0xff]  ;;  %s472_s17 = scalar_lea.vmem %s1628_s11, %s1544_s25  ;;  %s1337_s22 = smov 127   ;;  %vm931_vm8 = vcmask 48128   ;;  %vm933_vm9 = vcmask 56320  }
  0x79   : > { %v1067_v0 = vld [vmem:[%s1627_s10] ss:$0 sm:$0xff]  ;;  %s1338_s18 = smov 1   ;;  %s476_s26 = scalar_lea.vmem %s1629_s12, %s1544_s25 }
  0x7a   : > { %1118 = vmatpush3.bf16.msra.mxu0 %v1117_v47 }
  0x7b   : > { %1115 = vmatpush3.bf16.msra.mxu1 %v1114_v19  ;;  %1119 = vmatprep.subr.bf16.mxu0 %v1329_v16 }
  0x7e   : > { %1121 = vmatpush3.bf16.msra.mxu0 %v1120_v49 }
 0x14a   : > { %v558_v4 = vpop.f32.mrb[0].mxu0 }
 0x14b   : > { %v559_v5 = vadd.f32 %v1059_v3, %v558_v4  ;;  %v1087_v6 = vpop.f32.mrb[1].mxu0 }
 0x14d   : > { %v563_v7 = vsel %vm562_vm2, %v559_v5, 0.0 }
 0x14e   : > { %564 = vadd.xlane.f32.xlu0 %v563_v7 }
 0x1db   : > { %v565_v8 = vpop.xlane.xlu0 %564 }
 0x1dc   : > { %v567_v9 = vmul.f32 0.03125, %v565_v8 }
 0x1de   : > { %v568_v10 = vsub.f32 %v559_v5, %v567_v9 }
 0x1e0   : > { %v569_v11 = vmul.f32 %v568_v10, %v568_v10 }
 0x1e2   : > { %v570_v12 = vsel %vm562_vm2, %v569_v11, 0.0 }
 0x1e3   : > { %571 = vadd.xlane.f32.xlu0 %v570_v12 }
 0x270   : > { %v572_v20 = vpop.xlane.xlu0 %571 }
 0x271   : > { %v573_v21 = vmul.f32 0.03125, %v572_v20 }
 0x273   : > { %v574_v22 = vadd.f32 1e-05, %v573_v21 }
 0x275   : > { %1183 = vrsqrt.f32 %v574_v22 }
 0x27f   : > { %v1184_v23 = vpop.eup %1183 }
 0x280   : > { %v576_v25 = vmul.f32 %v1184_v23, %v568_v10 }
 0x282   : > { %v583_v27 = vmul.f32 %v1061_v24, %v576_v25 }
 0x284   : > { %v590_v28 = vadd.f32 %v1062_v26, %v583_v27 }
 0x286   : > { %v591_v29 = vmul.f32 0.5, %v590_v28 }
 0x288   : > { %1185 = vtanh.f32 %v591_v29 }
 0x292   : > { %v1186_v30 = vpop.eup %1185 }
 0x293   : > { %v593_v31 = vmul.f32 0.5, %v1186_v30  ;;  %v798_v30 = vld [vmem:[%s472_s17] sm:$0xff] }
 0x295   : > { %v594_v32 = vadd.f32 0.5, %v593_v31 }
 0x297   : > { %v595_v33 = vmul.f32 %v594_v32, %v590_v28 }
 0x299   : > { %1097 = vmatmul.mubr.msk.f32.vlgmr.msra.gmra.mrb[0].mxu1 %vm562_vm2, %v595_v33 }
 0x36c   : > { %v678_v35 = vpop.f32.mrb[0].mxu1 }
 0x36d   : > { %v679_v36 = vadd.f32 %v1063_v34, %v678_v35  ;;  %v1098_v37 = vpop.f32.mrb[1].mxu1 }
 0x36f   : > { %v682_v38 = vsel %vm562_vm2, %v679_v36, 0.0 }
 0x370   : > { %683 = vadd.xlane.f32.xlu1 %v682_v38 }
 0x3fd   : > { %v684_v39 = vpop.xlane.xlu1 %683 }
 0x3fe   : > { %v685_v40 = vmul.f32 0.03125, %v684_v39 }
 0x400   : > { %v686_v41 = vsub.f32 %v679_v36, %v685_v40 }
 0x402   : > { %v687_v42 = vmul.f32 %v686_v41, %v686_v41 }
 0x404   : > { %v688_v43 = vsel %vm562_vm2, %v687_v42, 0.0 }
 0x405   : > { %689 = vadd.xlane.f32.xlu1 %v688_v43 }
 0x492   : > { %v690_v50 = vpop.xlane.xlu1 %689 }
 0x493   : > { %v691_v51 = vmul.f32 0.03125, %v690_v50 }
 0x495   : > { %v692_v52 = vadd.f32 1e-05, %v691_v51 }
 0x497   : > { %1187 = vrsqrt.f32 %v692_v52 }
 0x4a1   : > { %v1188_v53 = vpop.eup %1187 }
 0x4a2   : > { %v694_v55 = vmul.f32 %v1188_v53, %v686_v41 }
 0x4a4   : > { %v701_v57 = vmul.f32 %v1065_v54, %v694_v55 }
 0x4a6   : > { %v708_v58 = vadd.f32 %v1066_v56, %v701_v57 }
 0x4a8   : > { %v709_v59 = vmul.f32 0.5, %v708_v58 }
 0x4aa   : > { %1189 = vtanh.f32 %v709_v59 }
 0x4b4   : > { %v1190_v60 = vpop.eup %1189 }
 0x4b5   : > { %v711_v61 = vmul.f32 0.5, %v1190_v60 }
 0x4b7   : > { %v712_v62 = vadd.f32 0.5, %v711_v61 }
 0x4b9   : > { %v713_v63 = vmul.f32 %v712_v62, %v708_v58 }
 0x4bb   : > { %1108 = vmatmul.mubr.msk.f32.vlgmr.msra.gmra.mrb[2].mxu0 %vm562_vm2, %v713_v63 }
 0x58e   : > { %v794_v1 = vpop.f32.mrb[2].mxu0 }
 0x58f   : > { %v795_v2 = vadd.f32 %v1067_v0, %v794_v1  ;;  %v1109_v3 = vpop.f32.mrb[3].mxu0 }
 0x591   : > { %v799_v4 = vmul.f32 %v795_v2, %v795_v2  ;;  %811 = vrot.lane.b32.xlu0 %v795_v2, %s1330_s13 }
 0x593   : > { %804 = vrot.lane.b32.xlu1 %v799_v4, %s1330_s13  ;;  %v800_v5 = vsel %vm488_vm1, %v799_v4, 0.0 }
 0x595   : > { %830 = vrot.lane.b32.xlu0 %v799_v4, %s1331_s29 }
 0x597   : > { %836 = vrot.lane.b32.xlu1 %v799_v4, %s1332_s27 }
 0x59b   : > { %861 = vrot.lane.b32.xlu1 %v799_v4, %s1333_s24 }
 0x59f   : > { %891 = vrot.lane.b32.xlu1 %v799_v4, %s1334_s15 }
 0x5b4   : > { %801 = vadd.xlane.f32.xlu0 %v800_v5 }
 0x603   : > { %v812_v6 = vpop.permute.xlu0 %811 }
 0x604   : > { %v814_v7 = vmul.f32 %v812_v6, %v795_v2 }
 0x605   : > { %v805_v9 = vpop.permute.xlu1 %804 }
 0x606   : > { %843 = vrot.lane.b32.xlu0 %v814_v7, %s1331_s29  ;;  %v815_v8 = vsel %vm488_vm1, %v814_v7, 0.0  ;;  %v807_v10 = vsel %vm488_vm1, %v805_v9, 0.0 }
 0x607   : > { %816 = vadd.xlane.f32.xlu1 %v815_v8  ;;  %v831_v11 = vpop.permute.xlu0 %830 }
 0x608   : > { %v833_v12 = vsel %vm488_vm1, %v831_v11, 0.0 }
 0x609   : > { %v837_v13 = vpop.permute.xlu1 %836 }
 0x60a   : > { %873 = vrot.lane.b32.xlu0 %v814_v7, %s1333_s24  ;;  %v839_v14 = vsel %vm488_vm1, %v837_v13, 0.0 }
 0x60d   : > { %v862_v15 = vpop.permute.xlu1 %861 }
 0x60e   : > { %903 = vrot.lane.b32.xlu0 %v814_v7, %s1334_s15  ;;  %v864_v16 = vsel %vm488_vm1, %v862_v15, 0.0 }
 0x611   : > { %v892_v24 = vpop.permute.xlu1 %891 }
 0x612   : > { %867 = vrot.lane.b32.xlu0 %v799_v4, %s1335_s30  ;;  %v894_v26 = vsel %vm488_vm1, %v892_v24, 0.0 }
 0x618   : > { %897 = vrot.lane.b32.xlu1 %v799_v4, %s1336_s14 }
 0x631   : > { %808 = vadd.xlane.f32.xlu0 %v807_v10 }
 0x635   : > { %834 = vadd.xlane.f32.xlu0 %v833_v12 }
 0x63c   : > { %840 = vadd.xlane.f32.xlu1 %v839_v14 }
 0x640   : > { %865 = vadd.xlane.f32.xlu1 %v864_v16 }
 0x641   : > { %v802_v17 = vpop.xlane.xlu0 %801 }
 0x642   : > { %v818_v43 = vmul.f32 %v802_v17, %v798_v30 }
 0x678   : > { %v844_v18 = vpop.permute.xlu0 %843 }
 0x679   : > { %v846_v19 = vsel %vm488_vm1, %v844_v18, 0.0 }
 0x67a   : > { %847 = vadd.xlane.f32.xlu0 %v846_v19 }
 0x67c   : > { %v874_v20 = vpop.permute.xlu0 %873 }
 0x67d   : > { %v876_v21 = vsel %vm488_vm1, %v874_v20, 0.0 }
 0x67e   : > { %877 = vadd.xlane.f32.xlu0 %v876_v21 }
 0x680   : > { %v904_v22 = vpop.permute.xlu0 %903 }
 0x681   : > { %v906_v23 = vsel %vm488_vm1, %v904_v22, 0.0 }
 0x682   : > { %907 = vadd.xlane.f32.xlu0 %v906_v23 }
 0x684   : > { %v868_v25 = vpop.permute.xlu0 %867 }
 0x685   : > { %v870_v27 = vsel %vm488_vm1, %v868_v25, 0.0 }
 0x686   : > { %895 = vadd.xlane.f32.xlu0 %v894_v26  ;;  %871 = vadd.xlane.f32.xlu1 %v870_v27 }
 0x694   : > { %v817_v28 = vpop.xlane.xlu1 %816 }
 0x695   : > { %v819_v32 = vmul.f32 %v817_v28, %v798_v30 }
 0x698   : > { %v898_v29 = vpop.permute.xlu1 %897 }
 0x699   : > { %v900_v31 = vsel %vm488_vm1, %v898_v29, 0.0 }
 0x69a   : > { %901 = vadd.xlane.f32.xlu1 %v900_v31 }
 0x69c   : > { %821 = vrot.lane.b32.xlu0 %v819_v32, %s1337_s22 }
 0x6a0   : > { %826 = vrot.lane.b32.xlu0 %v819_v32, %s1338_s18 }
 0x6be   : > { %v809_v33 = vpop.xlane.xlu0 %808 }
 0x6bf   : > { %v825_v44 = vmul.f32 %v809_v33, %v798_v30 }
 0x6c2   : > { %v835_v34 = vpop.xlane.xlu0 %834 }
 0x6c3   : > { %v849_v53 = vmul.f32 %v835_v34, %v798_v30 }
 0x6c9   : > { %v841_v49 = vpop.xlane.xlu1 %840 }
 0x6ca   : > { %v856_v56 = vmul.f32 %v841_v49, %v798_v30 }
 0x6cd   : > { %v866_v50 = vpop.xlane.xlu1 %865 }
 0x6ce   : > { %v879_v57 = vmul.f32 %v866_v50, %v798_v30 }
 0x707   : > { %v848_v35 = vpop.xlane.xlu0 %847 }
 0x708   : > { %v850_v36 = vmul.f32 %v848_v35, %v798_v30 }
 0x70a   : > { %852 = vrot.lane.b32.xlu1 %v850_v36, %s1337_s22 }
 0x70b   : > { %v878_v37 = vpop.xlane.xlu0 %877 }
 0x70c   : > { %v880_v38 = vmul.f32 %v878_v37, %v798_v30 }
 0x70e   : > { %857 = vrot.lane.b32.xlu1 %v850_v36, %s1338_s18  ;;  %882 = vrot.lane.b32.xlu0 %v880_v38, %s1337_s22 }
 0x70f   : > { %v908_v39 = vpop.xlane.xlu0 %907 }
 0x710   : > { %v910_v40 = vmul.f32 %v908_v39, %v798_v30 }
 0x712   : > { %887 = vrot.lane.b32.xlu1 %v880_v38, %s1338_s18  ;;  %912 = vrot.lane.b32.xlu0 %v910_v40, %s1337_s22 }
 0x713   : > { %v896_v41 = vpop.xlane.xlu0 %895  ;;  %v872_v51 = vpop.xlane.xlu1 %871 }
 0x714   : > { %v886_v63 = vmul.f32 %v872_v51, %v798_v30  ;;  %v909_v1 = vmul.f32 %v896_v41, %v798_v30 }
 0x716   : > { %917 = vrot.lane.b32.xlu1 %v910_v40, %s1338_s18 }
 0x717   : > { %v822_v42 = vpop.permute.xlu0 %821 }
 0x718   : > { %v824_v46 = vadd.f32 %v822_v42, %v818_v43 }
 0x71b   : > { %v827_v45 = vpop.permute.xlu0 %826 }
 0x71c   : > { %v829_v47 = vadd.f32 %v827_v45, %v825_v44 }
 0x71e   : > { %v922_v48 = vsel %vm921_vm3, %v824_v46, %v829_v47 }
 0x727   : > { %v902_v52 = vpop.xlane.xlu1 %901 }
 0x728   : > { %v916_v7 = vmul.f32 %v902_v52, %v798_v30 }
 0x77c   : > { %v853_v54 = vpop.permute.xlu1 %852 }
 0x77d   : > { %v855_v55 = vadd.f32 %v853_v54, %v849_v53 }
 0x77f   : > { %v924_v61 = vsel %vm923_vm4, %v922_v48, %v855_v55 }
 0x780   : > { %v858_v58 = vpop.permute.xlu1 %857  ;;  %v883_v59 = vpop.permute.xlu0 %882 }
 0x781   : > { %v860_v60 = vadd.f32 %v858_v58, %v856_v56  ;;  %v885_v62 = vadd.f32 %v883_v59, %v879_v57 }
 0x783   : > { %v926_v0 = vsel %vm925_vm5, %v924_v61, %v860_v60 }
 0x784   : > { %v888_v2 = vpop.permute.xlu1 %887  ;;  %v913_v3 = vpop.permute.xlu0 %912  ;;  %v928_v5 = vsel %vm927_vm6, %v926_v0, %v885_v62 }
 0x785   : > { %v890_v4 = vadd.f32 %v888_v2, %v886_v63  ;;  %v915_v6 = vadd.f32 %v913_v3, %v909_v1 }
 0x787   : > { %v930_v8 = vsel %vm929_vm7, %v928_v5, %v890_v4 }
 0x788   : > { %v918_v9 = vpop.permute.xlu1 %917  ;;  %v932_v11 = vsel %vm931_vm8, %v930_v8, %v915_v6 }
 0x789   : > { %v920_v10 = vadd.f32 %v918_v9, %v916_v7 }
 0x78b   : > { %v934_v12 = vsel %vm933_vm9, %v932_v11, %v920_v10 }
 0x78c   : > { %v935_v13 = vmul.f32 0.35355338, %v934_v12 }
 0x78e   : > { %936 = vst.msk [vmem:[%s476_s26] sm:$0xff] %vm488_vm1, %v935_v13 }
 0x78f PF: > { %s25_s21 = sadd.s32 1, %s1321_s21  }
 0x790   : > { %p22_p11 = scmp.ge.s32.totalorder %s25_s21, 4  }
 0x792   :  { %24 = sbr.rel (!%p22_p11) target bundleno = 3 (0x3), region = 118 }
 0x799   :  { %956 = vsyncpa [#allocation3], 1 }
 0x79a   :  { %958 = vsyncpa [#allocation3 + $0x1], 1 }
 0x79b   :  { %959 = vsyncpa [#allocation5], 1 }
 0x79c   :  { %960 = vsyncpa [#allocation8], 1 }

</bundles_post_ra>
